<compile_context>
chip_gen: v7x
topology: tpu7x:2x2x1
jax: 0.10.0
libtpu: 0.0.40
codegen_flags: <defaults>
</compile_context>

<pallas_src>
import functools

import jax
import jax.numpy as jnp
from jax.experimental import pallas as pl
from jax.experimental.pallas import tpu as pltpu

LANE = 128      # vreg lane width (last dim)
SUBLANE = 8     # vreg sublane width (second-to-last dim)


def _round_up(n, m):
    return ((n + m - 1) // m) * m


def _hw_vmem_bytes():
    """Physical VMEM per core; conservative (v7x-sized) fallback off-TPU."""
    try:
        return int(pltpu.get_tpu_info().vmem_capacity_bytes)
    except Exception:
        return 64 << 20


# ---------------------------------------------------------------------------
# Kernel: one batch tile through all four layers, fully fused.
# ---------------------------------------------------------------------------
def _dqn_kernel(x_ref, w1_ref, b1_ref, w2_ref, b2_ref,
                w3_ref, b3_ref, w4_ref, b4_ref, o_ref):
    def layer(a, w_ref, b_ref):
        # Feed the MXU the weight dtype (bf16 when enabled), accumulate in f32,
        # keep the bias/ReLU epilogue in f32 (v5e has no bf16 VPU).
        if a.dtype != w_ref.dtype:
            a = a.astype(w_ref.dtype)
        return jnp.dot(a, w_ref[...], preferred_element_type=jnp.float32) + b_ref[...]

    h = jnp.maximum(layer(x_ref[...], w1_ref, b1_ref), 0.0)
    h = jnp.maximum(layer(h, w2_ref, b2_ref), 0.0)
    h = jnp.maximum(layer(h, w3_ref, b3_ref), 0.0)
    o_ref[...] = layer(h, w4_ref, b4_ref).astype(o_ref.dtype)


# ---------------------------------------------------------------------------
# Wrapper
# ---------------------------------------------------------------------------
@functools.partial(jax.jit, static_argnames=("action_size",))
def dqn_forward(x, padded_params, *, action_size):
    """x: (B, state_size).  padded_params: output of pad_params()."""
    p = padded_params
    B, S = x.shape
    assert p["w1"].shape[0] == S, "pad_params must keep w1's input dim un-padded"
    Hp = p["w1"].shape[1]
    Ap = p["w4"].shape[1]

    # --- batch tiling: minimize padding, give v7x's 2 TCs >=2 tiles ----------
    TILE_TARGET = 256
    ntiles = max(1, pl.cdiv(B, TILE_TARGET))
    if B >= 16:
        ntiles = max(ntiles, 2)              # lets "parallel" shard on v7x; no-op on v5e/v6e
    TB = _round_up(pl.cdiv(B, ntiles), SUBLANE)
    B_pad = ntiles * TB

    # Only the batch dim is padded (zeros); the feature dim stays = state_size.
    xp = x if B_pad == B else jnp.pad(x, ((0, B_pad - B), (0, 0)))

    # Grid-invariant operands: whole array resident in VMEM, no double-buffering.
    resident = pl.BlockSpec(memory_space=pltpu.MemorySpace.VMEM)

    in_specs = [
        # Streamed x tile.  Last dim == full array dim (legal even though < 128).
        # TODO(synk): sweep pipeline_mode=pl.Buffered(3) here for very large grids.
        pl.BlockSpec((TB, S), lambda i: (i, 0)),
        resident, resident,      # w1, b1
        resident, resident,      # w2, b2
        resident, resident,      # w3, b3
        resident, resident,      # w4, b4
    ]
    out_spec = pl.BlockSpec((TB, Ap), lambda i: (i, 0))

    wbytes = sum(int(v.size) * v.dtype.itemsize for v in p.values())
    flops = 2 * B_pad * (S * Hp + 2 * Hp * Hp + Hp * Ap)
    bytes_accessed = int(xp.size) * xp.dtype.itemsize + wbytes + B_pad * Ap * 4

    # VMEM budget: double-buffered x/out tiles + single-buffered resident
    # weights/biases + a few live (TB, Hp) f32 activations + headroom,
    # capped at 90% of the physical VMEM of whatever chip we run on.
    needed = (2 * (TB * S * xp.dtype.itemsize + TB * Ap * 4)
              + wbytes + 4 * TB * Hp * 4 + (4 << 20))
    vmem_limit = int(min(max(needed, 16 << 20), int(0.9 * _hw_vmem_bytes())))

    out = pl.pallas_call(
        _dqn_kernel,
        out_shape=jax.ShapeDtypeStruct((B_pad, Ap), jnp.float32),
        grid=(ntiles,),
        in_specs=in_specs,
        out_specs=out_spec,
        compiler_params=pltpu.CompilerParams(
            dimension_semantics=("parallel",),
            vmem_limit_bytes=vmem_limit,
        ),
        cost_estimate=pl.CostEstimate(
            flops=flops, transcendentals=0, bytes_accessed=bytes_accessed),
    )(xp, p["w1"], p["b1"], p["w2"], p["b2"], p["w3"], p["b3"], p["w4"], p["b4"])

    # Slice real rows / action columns outside the kernel (kernel stays lane-dense).
    return out[:B, :action_size]


# ---------------------------------------------------------------------------
# Params (PyTorch nn.Linear default init) + lane padding of the OUTPUT dims.
# ---------------------------------------------------------------------------
def init_dqn_params(key, state_size, action_size, linear_size):
    """Uniform +-1/sqrt(fan_in), weights stored (in, out) so y = x @ W + b."""
    def linear(k, fan_in, fan_out):
        kw, kb = jax.random.split(k)
        bound = 1.0 / jnp.sqrt(float(fan_in))
        w = jax.random.uniform(kw, (fan_in, fan_out), jnp.float32, -bound, bound)
        b = jax.random.uniform(kb, (1, fan_out), jnp.float32, -bound, bound)
        return w, b

    k1, k2, k3, k4 = jax.random.split(key, 4)
    w1, b1 = linear(k1, state_size, linear_size)
    w2, b2 = linear(k2, linear_size, linear_size)
    w3, b3 = linear(k3, linear_size, linear_size)
    w4, b4 = linear(k4, linear_size, action_size)
    return dict(w1=w1, b1=b1, w2=w2, b2=b2, w3=w3, b3=b3, w4=w4, b4=b4)


def pad_params(params, weight_dtype=jnp.float32):
    """Zero-pad hidden/action dims to multiples of 128 (lane width).  The input
    (state) dim of w1 is left un-padded so x is streamed at its natural width.
    Padding is zeros -> exact maths.  Pass weight_dtype=jnp.bfloat16 on v6e/v7x
    for realistic linear_size (halves weight HBM/VMEM, bf16-native MXU)."""
    def pad2(a, rows, cols, dtype):
        return jnp.pad(a, ((0, rows - a.shape[0]), (0, cols - a.shape[1]))).astype(dtype)

    S, H = params["w1"].shape
    A = params["w4"].shape[1]
    Hp = _round_up(H, LANE)
    Ap = _round_up(A, LANE)
    return dict(
        w1=pad2(params["w1"], S, Hp, weight_dtype),   # input dim stays = state_size
        b1=pad2(params["b1"], 1, Hp, jnp.float32),
        w2=pad2(params["w2"], Hp, Hp, weight_dtype),
        b2=pad2(params["b2"], 1, Hp, jnp.float32),
        w3=pad2(params["w3"], Hp, Hp, weight_dtype),
        b3=pad2(params["b3"], 1, Hp, jnp.float32),
        w4=pad2(params["w4"], Hp, Ap, weight_dtype),
        b4=pad2(params["b4"], 1, Ap, jnp.float32),
    )


def _reference_forward(x, p):
    h = jnp.maximum(x @ p["w1"] + p["b1"], 0.0)
    h = jnp.maximum(h @ p["w2"] + p["b2"], 0.0)
    h = jnp.maximum(h @ p["w3"] + p["b3"], 0.0)
    return h @ p["w4"] + p["b4"]


if __name__ == "__main__":
    state_size, action_size, linear_size = 8, 4, 32
    batch = 2

    key = jax.random.PRNGKey(0)
    k_params, k_x = jax.random.split(key)

    raw_params = init_dqn_params(k_params, state_size, action_size, linear_size)
    # f32 weights at these tiny shapes (exact self-check); flip to
    # weight_dtype=jnp.bfloat16 on v6e/v7x once linear_size >= 128 / batch >= 256.
    params = pad_params(raw_params, weight_dtype=jnp.float32)
    x = jax.random.normal(k_x, (batch, state_size), jnp.float32)

    out = dqn_forward(x, params, action_size=action_size)
    out = jax.block_until_ready(out)

    ref = _reference_forward(x, raw_params)
    assert out.shape == (batch, action_size), out.shape
    assert jnp.allclose(out, ref, atol=1e-5, rtol=1e-5), "mismatch vs reference"

    print("KERNEL_OK")
</pallas_src>

<mosaic_0001>
module attributes {stable_mosaic.version = 11 : i64} {
  func.func @_dqn_kernel(%arg0: i32, %arg1: memref<8x8xf32, #tpu.memory_space<vmem>>, %arg2: memref<8x128xf32, #tpu.memory_space<vmem>>, %arg3: memref<1x128xf32, #tpu.memory_space<vmem>>, %arg4: memref<128x128xf32, #tpu.memory_space<vmem>>, %arg5: memref<1x128xf32, #tpu.memory_space<vmem>>, %arg6: memref<128x128xf32, #tpu.memory_space<vmem>>, %arg7: memref<1x128xf32, #tpu.memory_space<vmem>>, %arg8: memref<128x128xf32, #tpu.memory_space<vmem>>, %arg9: memref<1x128xf32, #tpu.memory_space<vmem>>, %arg10: memref<8x128xf32, #tpu.memory_space<vmem>>) attributes {dimension_semantics = [#tpu.dimension_semantics<parallel>], iteration_bounds = array<i64: 1>, scalar_prefetch = 0 : i64, scratch_operands = 0 : i64, tpu.core_type = #tpu.core_type<tc>, window_params = [{transform_indices = @transform_0, window_bounds = array<i64: 8, 8>}, {pipeline_mode = #tpu.pipeline_mode<synchronous>, transform_indices = @transform_1, window_bounds = array<i64: 8, 128>}, {pipeline_mode = #tpu.pipeline_mode<synchronous>, transform_indices = @transform_2, window_bounds = array<i64: 1, 128>}, {pipeline_mode = #tpu.pipeline_mode<synchronous>, transform_indices = @transform_3, window_bounds = array<i64: 128, 128>}, {pipeline_mode = #tpu.pipeline_mode<synchronous>, transform_indices = @transform_4, window_bounds = array<i64: 1, 128>}, {pipeline_mode = #tpu.pipeline_mode<synchronous>, transform_indices = @transform_5, window_bounds = array<i64: 128, 128>}, {pipeline_mode = #tpu.pipeline_mode<synchronous>, transform_indices = @transform_6, window_bounds = array<i64: 1, 128>}, {pipeline_mode = #tpu.pipeline_mode<synchronous>, transform_indices = @transform_7, window_bounds = array<i64: 128, 128>}, {pipeline_mode = #tpu.pipeline_mode<synchronous>, transform_indices = @transform_8, window_bounds = array<i64: 1, 128>}, {transform_indices = @transform_9, window_bounds = array<i64: 8, 128>}]} {
    %c0 = arith.constant 0 : index
    %c0_0 = arith.constant 0 : index
    %0 = vector.load %arg1[%c0, %c0_0] : memref<8x8xf32, #tpu.memory_space<vmem>>, vector<8x8xf32>
    %c0_1 = arith.constant 0 : index
    %c0_2 = arith.constant 0 : index
    %1 = vector.load %arg2[%c0_1, %c0_2] : memref<8x128xf32, #tpu.memory_space<vmem>>, vector<8x128xf32>
    %cst = arith.constant dense<0.000000e+00> : vector<8x128xf32>
    %2 = tpu.matmul %0, %1, %cst {dimension_numbers = #tpu.dot_dimension_numbers<[1], [0], [0], [1], [0, 0, 1, 1], [], []>} : vector<8x8xf32>, vector<8x128xf32>, vector<8x128xf32> -> vector<8x128xf32>
    %c0_3 = arith.constant 0 : index
    %c0_4 = arith.constant 0 : index
    %3 = vector.load %arg3[%c0_3, %c0_4] : memref<1x128xf32, #tpu.memory_space<vmem>>, vector<1x128xf32>
    %4 = vector.broadcast %3 : vector<1x128xf32> to vector<8x128xf32>
    %5 = arith.addf %2, %4 : vector<8x128xf32>
    %cst_5 = arith.constant 0.000000e+00 : f32
    %6 = vector.broadcast %cst_5 : f32 to vector<8x128xf32>
    %7 = arith.maximumf %5, %6 : vector<8x128xf32>
    %c0_6 = arith.constant 0 : index
    %c0_7 = arith.constant 0 : index
    %8 = vector.load %arg4[%c0_6, %c0_7] : memref<128x128xf32, #tpu.memory_space<vmem>>, vector<128x128xf32>
    %cst_8 = arith.constant dense<0.000000e+00> : vector<8x128xf32>
    %9 = tpu.matmul %7, %8, %cst_8 {dimension_numbers = #tpu.dot_dimension_numbers<[1], [0], [0], [1], [0, 0, 1, 1], [], []>} : vector<8x128xf32>, vector<128x128xf32>, vector<8x128xf32> -> vector<8x128xf32>
    %c0_9 = arith.constant 0 : index
    %c0_10 = arith.constant 0 : index
    %10 = vector.load %arg5[%c0_9, %c0_10] : memref<1x128xf32, #tpu.memory_space<vmem>>, vector<1x128xf32>
    %11 = vector.broadcast %10 : vector<1x128xf32> to vector<8x128xf32>
    %12 = arith.addf %9, %11 : vector<8x128xf32>
    %cst_11 = arith.constant 0.000000e+00 : f32
    %13 = vector.broadcast %cst_11 : f32 to vector<8x128xf32>
    %14 = arith.maximumf %12, %13 : vector<8x128xf32>
    %c0_12 = arith.constant 0 : index
    %c0_13 = arith.constant 0 : index
    %15 = vector.load %arg6[%c0_12, %c0_13] : memref<128x128xf32, #tpu.memory_space<vmem>>, vector<128x128xf32>
    %cst_14 = arith.constant dense<0.000000e+00> : vector<8x128xf32>
    %16 = tpu.matmul %14, %15, %cst_14 {dimension_numbers = #tpu.dot_dimension_numbers<[1], [0], [0], [1], [0, 0, 1, 1], [], []>} : vector<8x128xf32>, vector<128x128xf32>, vector<8x128xf32> -> vector<8x128xf32>
    %c0_15 = arith.constant 0 : index
    %c0_16 = arith.constant 0 : index
    %17 = vector.load %arg7[%c0_15, %c0_16] : memref<1x128xf32, #tpu.memory_space<vmem>>, vector<1x128xf32>
    %18 = vector.broadcast %17 : vector<1x128xf32> to vector<8x128xf32>
    %19 = arith.addf %16, %18 : vector<8x128xf32>
    %cst_17 = arith.constant 0.000000e+00 : f32
    %20 = vector.broadcast %cst_17 : f32 to vector<8x128xf32>
    %21 = arith.maximumf %19, %20 : vector<8x128xf32>
    %c0_18 = arith.constant 0 : index
    %c0_19 = arith.constant 0 : index
    %22 = vector.load %arg8[%c0_18, %c0_19] : memref<128x128xf32, #tpu.memory_space<vmem>>, vector<128x128xf32>
    %cst_20 = arith.constant dense<0.000000e+00> : vector<8x128xf32>
    %23 = tpu.matmul %21, %22, %cst_20 {dimension_numbers = #tpu.dot_dimension_numbers<[1], [0], [0], [1], [0, 0, 1, 1], [], []>} : vector<8x128xf32>, vector<128x128xf32>, vector<8x128xf32> -> vector<8x128xf32>
    %c0_21 = arith.constant 0 : index
    %c0_22 = arith.constant 0 : index
    %24 = vector.load %arg9[%c0_21, %c0_22] : memref<1x128xf32, #tpu.memory_space<vmem>>, vector<1x128xf32>
    %25 = vector.broadcast %24 : vector<1x128xf32> to vector<8x128xf32>
    %26 = arith.addf %23, %25 : vector<8x128xf32>
    %c0_23 = arith.constant 0 : index
    %c0_24 = arith.constant 0 : index
    %27 = vector.load %arg10[%c0_23, %c0_24] : memref<8x128xf32, #tpu.memory_space<vmem>>, vector<8x128xf32>
    tpu.vector_store %arg10[%c0_23, %c0_24], %26 {strides = array<i32>} : memref<8x128xf32, #tpu.memory_space<vmem>>, vector<8x128xf32>,
    return
  }
  func.func @transform_0(%arg0: i32) -> (i32, i32) {
    %c0_i32 = arith.constant 0 : i32
    %c0_i32_0 = arith.constant 0 : i32
    return %arg0, %c0_i32 : i32, i32
  }
  func.func @transform_1(%arg0: i32) -> (i32, i32) {
    %c0_i32 = arith.constant 0 : i32
    %c0_i32_0 = arith.constant 0 : i32
    %c0_i32_1 = arith.constant 0 : i32
    return %c0_i32, %c0_i32_0 : i32, i32
  }
  func.func @transform_2(%arg0: i32) -> (i32, i32) {
    %c0_i32 = arith.constant 0 : i32
    %c0_i32_0 = arith.constant 0 : i32
    %c0_i32_1 = arith.constant 0 : i32
    return %c0_i32, %c0_i32_0 : i32, i32
  }
  func.func @transform_3(%arg0: i32) -> (i32, i32) {
    %c0_i32 = arith.constant 0 : i32
    %c0_i32_0 = arith.constant 0 : i32
    %c0_i32_1 = arith.constant 0 : i32
    return %c0_i32, %c0_i32_0 : i32, i32
  }
  func.func @transform_4(%arg0: i32) -> (i32, i32) {
    %c0_i32 = arith.constant 0 : i32
    %c0_i32_0 = arith.constant 0 : i32
    %c0_i32_1 = arith.constant 0 : i32
    return %c0_i32, %c0_i32_0 : i32, i32
  }
  func.func @transform_5(%arg0: i32) -> (i32, i32) {
    %c0_i32 = arith.constant 0 : i32
    %c0_i32_0 = arith.constant 0 : i32
    %c0_i32_1 = arith.constant 0 : i32
    return %c0_i32, %c0_i32_0 : i32, i32
  }
  func.func @transform_6(%arg0: i32) -> (i32, i32) {
    %c0_i32 = arith.constant 0 : i32
    %c0_i32_0 = arith.constant 0 : i32
    %c0_i32_1 = arith.constant 0 : i32
    return %c0_i32, %c0_i32_0 : i32, i32
  }
  func.func @transform_7(%arg0: i32) -> (i32, i32) {
    %c0_i32 = arith.constant 0 : i32
    %c0_i32_0 = arith.constant 0 : i32
    %c0_i32_1 = arith.constant 0 : i32
    return %c0_i32, %c0_i32_0 : i32, i32
  }
  func.func @transform_8(%arg0: i32) -> (i32, i32) {
    %c0_i32 = arith.constant 0 : i32
    %c0_i32_0 = arith.constant 0 : i32
    %c0_i32_1 = arith.constant 0 : i32
    return %c0_i32, %c0_i32_0 : i32, i32
  }
  func.func @transform_9(%arg0: i32) -> (i32, i32) {
    %c0_i32 = arith.constant 0 : i32
    %c0_i32_0 = arith.constant 0 : i32
    return %arg0, %c0_i32 : i32, i32
  }
}

</mosaic_0001>

<bundles_post_ra>
// kernel: dqn_forward.1
= control target key start
LH: loop header
LB: loop body
LE: loop exit
PB: predicated region body
PF: predicated region fallthrough
CT: control target
= control target key end

     0   :  { %14 = vsyncpa [#allocation3], 0  ;;  %s927_s0 = inlined_call_operand.vmem [shape: f32[8,8], index: 0, kind: input, shape index: {}]   ;;  %s928_s1 = inlined_call_operand.vmem [shape: f32[8,128], index: 1, kind: input, shape index: {}]   ;;  %s929_s2 = inlined_call_operand.vmem [shape: f32[1,128], index: 2, kind: input, shape index: {}]   ;;  %s930_s3 = inlined_call_operand.hbm [shape: f32[128,128], index: 3, kind: input, shape index: {}]   ;;  %s931_s4 = inlined_call_operand.vmem [shape: f32[1,128], index: 4, kind: input, shape index: {}]   ;;  %s932_s5 = inlined_call_operand.hbm [shape: f32[128,128], index: 5, kind: input, shape index: {}]   ;;  %s933_s6 = inlined_call_operand.vmem [shape: f32[1,128], index: 6, kind: input, shape index: {}]   ;;  %s934_s7 = inlined_call_operand.hbm [shape: f32[128,128], index: 7, kind: input, shape index: {}]   ;;  %s935_s8 = inlined_call_operand.vmem [shape: f32[1,128], index: 8, kind: input, shape index: {}]   ;;  %s936_s9 = inlined_call_operand.vmem [shape: f32[8,128], index: 9, kind: output, shape index: {}]  }
   0x1   :  { %15 = vsyncpa [#allocation5], 0  ;;  %s763_s30 = smov [#allocation4]   ;;  %s764_s11 = smov [#allocation2]  }
   0x2   :  { %s41_s10 = sshll.u32 %s763_s30, 4  ;;  %s27_s12 = sshll.u32 %s764_s11, 4  ;;  %s42_s10 = int_to_ptr.vmem [resolvable:$true] %s41_s10  ;;  %s821_s12 = int_to_ptr.vmem [resolvable:$true] %s27_s12 }
   0x3   :  { %s693_s15 = scalar_lea.hbm %s932_s5, 2048 }
   0x4   :  { %p694_p0 = scmp.ne.s32.totalorder %s932_s5, %s693_s15  ;;  %p697_p1 = scmp.lt.u32.totalorder %s693_s15, %s932_s5 }
   0x6   :  { %p699_p2 = pnand %p697_p1, %p694_p0 }
   0x8   :  { %702 = shalt.err (!%p699_p2)
}
   0x9   :  { %s703_s20 = scalar_lea.vmem %s42_s10, 2048  ;;  %p708_p4 = scmp.lt.s32.totalorder %s42_s10, %s42_s10 }
   0xa   :  { %p704_p3 = scmp.ne.s32.totalorder %s42_s10, %s703_s20  ;;  %p709_p5 = scmp.lt.s32.totalorder %s703_s20, %s703_s20 }
   0xc   :  { %p710_p6 = por %p709_p5, %p708_p4 }
   0xe   :  { %p711_p7 = pnand %p710_p6, %p704_p3 }
  0x10   :  { %714 = shalt.err (!%p711_p7)
}
  0x11   :  { %s765_s21 = smov 128   ;;  %s766_s22 = smov 8  }
  0x12   :  { %47 = dma.hbm_to_vmem [thread:$0]  %s932_s5, 2048, %s42_s10, [#allocation5], %s765_s21, %s765_s21, %s766_s22  }
  0x13   :  { %s715_s27 = scalar_lea.hbm %s930_s3, 2048 }
  0x14   :  { %p716_p8 = scmp.ne.s32.totalorder %s930_s3, %s715_s27  ;;  %p719_p9 = scmp.lt.u32.totalorder %s715_s27, %s930_s3 }
  0x16   :  { %p721_p10 = pnand %p719_p9, %p716_p8 }
  0x18   :  { %724 = shalt.err (!%p721_p10)
}
  0x19   :  { %s725_s13 = scalar_lea.vmem %s821_s12, 2048  ;;  %p730_p12 = scmp.lt.s32.totalorder %s821_s12, %s821_s12 }
  0x1a   :  { %p726_p11 = scmp.ne.s32.totalorder %s821_s12, %s725_s13  ;;  %p731_p13 = scmp.lt.s32.totalorder %s725_s13, %s725_s13 }
  0x1c   :  { %p732_p0 = por %p731_p13, %p730_p12 }
  0x1e   :  { %p733_p1 = pnand %p732_p0, %p726_p11 }
  0x20   :  { %736 = shalt.err (!%p733_p1)
}
  0x21   :  { %33 = dma.hbm_to_vmem [thread:$0]  %s930_s3, 2048, %s821_s12, [#allocation3], %s765_s21, %s765_s21, %s766_s22  }
  0x22   :  { %s767_s14 = smov [#allocation6]   ;;  %s737_s18 = scalar_lea.hbm %s934_s7, 2048 }
  0x23   :  { %s55_s15 = sshll.u32 %s767_s14, 4  ;;  %p738_p2 = scmp.ne.s32.totalorder %s934_s7, %s737_s18  ;;  %s56_s15 = int_to_ptr.vmem [resolvable:$true] %s55_s15 }
  0x24   :  { %p741_p3 = scmp.lt.u32.totalorder %s737_s18, %s934_s7 }
  0x26   :  { %p743_p4 = pnand %p741_p3, %p738_p2 }
  0x28   :  { %746 = shalt.err (!%p743_p4)
}
  0x29   :  { %s747_s25 = scalar_lea.vmem %s56_s15, 2048  ;;  %p752_p6 = scmp.lt.s32.totalorder %s56_s15, %s56_s15 }
  0x2a   :  { %p748_p5 = scmp.ne.s32.totalorder %s56_s15, %s747_s25  ;;  %p753_p7 = scmp.lt.s32.totalorder %s747_s25, %s747_s25 }
  0x2c   :  { %p754_p8 = por %p753_p7, %p752_p6 }
  0x2e   :  { %p755_p9 = pnand %p754_p8, %p748_p5 }
  0x30   :  { %758 = shalt.err (!%p755_p9)
}
  0x31   :  { %61 = dma.hbm_to_vmem [thread:$0]  %s934_s7, 2048, %s56_s15, [#allocation5], %s765_s21, %s765_s21, %s766_s22  }
  0x32   :  { %759 = dma.done.wait [#allocation3], 2048  }
  0x33   :  { %760 = vsyncadd [#allocation3], 4294965248 }
  0x34   :  { %761 = dma.done.wait [#allocation5], 4096  }
  0x35   :  { %762 = vsyncadd [#allocation5], 4294963200  ;;  %v768_v0 = vmov 0.0   ;;  %vm769_vm0 = vmmov 0   ;;  %v770_v1 = vmov 0.0|0.0   ;;  %vm82_vm1 = vcmask 64512  }
  0x36   :  { %503 = vmatprep.subr.mxu0 %v768_v0  ;;  %505 = vmatprep.mubr.msk.f32.mxu0 %vm769_vm0, %v768_v0  ;;  %v74_v2 = vld [vmem:[%s928_s1] sm:$0xff]  ;;  %v158_v5 = vld [vmem:[#allocation2 + $0x8] sm:$0xff]  ;;  %v159_v6 = vld [vmem:[#allocation2 + $0x10] sm:$0xff] }
  0x37   :  { %613 = vmatprep.subr.bf16.mxu1 %v770_v1  ;;  %540 = vmatprep.mubr.msk.f32.mxu1 %vm769_vm0, %v768_v0  ;;  %v73_v3 = vld [vmem:[%s927_s0] sm:$0xff]  ;;  %v160_v7 = vld [vmem:[#allocation2 + $0x18] sm:$0xff]  ;;  %v162_v11 = vld [vmem:[#allocation2 + $0x28] sm:$0xff] }
  0x38   :  { %v157_v4 = vld [vmem:[#allocation2] sm:$0xff]  ;;  %504 = vmatpush3.msra.mxu0 %v74_v2  ;;  %v617_v9 = vpack.c.bf16 %v160_v7, %v159_v6  ;;  %v163_v13 = vld [vmem:[#allocation2 + $0x30] sm:$0xff]  ;;  %v164_v14 = vld [vmem:[#allocation2 + $0x38] sm:$0xff] }
  0x39   :  { %506 = vmatmul.mubr.msk.f32.vlgmr.msra.gmra.mrb[0].mxu0 %vm82_vm1, %v73_v3  ;;  %v614_v8 = vpack.c.bf16 %v158_v5, %v157_v4  ;;  %637 = vmatprep.subr.bf16.mxu0 %v770_v1  ;;  %v161_v10 = vld [vmem:[#allocation2 + $0x20] sm:$0xff]  ;;  %v623_v15 = vpack.c.bf16 %v164_v14, %v163_v13  ;;  %v166_v17 = vld [vmem:[#allocation2 + $0x48] sm:$0xff]  ;;  %v167_v19 = vld [vmem:[#allocation2 + $0x50] sm:$0xff] }
  0x3a   :  { %575 = vmatprep.mubr.msk.f32.mxu0 %vm769_vm0, %v768_v0  ;;  %v620_v12 = vpack.c.bf16 %v162_v11, %v161_v10  ;;  %v165_v16 = vld [vmem:[#allocation2 + $0x40] sm:$0xff]  ;;  %v168_v20 = vld [vmem:[#allocation2 + $0x58] sm:$0xff]  ;;  %v170_v23 = vld [vmem:[#allocation2 + $0x68] sm:$0xff] }
  0x3b   :  { %615 = vmatpush3.bf16.msra.mxu1 %v614_v8  ;;  %v626_v18 = vpack.c.bf16 %v166_v17, %v165_v16  ;;  %v629_v21 = vpack.c.bf16 %v168_v20, %v167_v19  ;;  %v169_v22 = vld [vmem:[#allocation2 + $0x60] sm:$0xff]  ;;  %v171_v25 = vld [vmem:[#allocation2 + $0x70] sm:$0xff]  ;;  %v172_v26 = vld [vmem:[#allocation2 + $0x78] sm:$0xff] }
  0x3c   :  { %616 = vmatprep.subr.bf16.mxu1 %v770_v1  ;;  %v632_v24 = vpack.c.bf16 %v170_v23, %v169_v22  ;;  %v635_v27 = vpack.c.bf16 %v172_v26, %v171_v25  ;;  %v251_v28 = vld [vmem:[#allocation4] sm:$0xff]  ;;  %v252_v29 = vld [vmem:[#allocation4 + $0x8] sm:$0xff]  ;;  %v253_v30 = vld [vmem:[#allocation4 + $0x10] sm:$0xff] }
  0x3d   :  { %v638_v31 = vpack.c.bf16 %v252_v29, %v251_v28  ;;  %v254_v32 = vld [vmem:[#allocation4 + $0x18] sm:$0xff]  ;;  %v255_v34 = vld [vmem:[#allocation4 + $0x20] sm:$0xff]  ;;  %v256_v35 = vld [vmem:[#allocation4 + $0x28] sm:$0xff] }
  0x3e   :  { %v641_v33 = vpack.c.bf16 %v254_v32, %v253_v30  ;;  %v644_v36 = vpack.c.bf16 %v256_v35, %v255_v34  ;;  %v257_v37 = vld [vmem:[#allocation4 + $0x30] sm:$0xff]  ;;  %v258_v38 = vld [vmem:[#allocation4 + $0x38] sm:$0xff]  ;;  %v259_v40 = vld [vmem:[#allocation4 + $0x40] sm:$0xff] }
  0x3f   :  { %618 = vmatpush3.bf16.msra.mxu1 %v617_v9  ;;  %639 = vmatpush3.bf16.msra.mxu0 %v638_v31  ;;  %v647_v39 = vpack.c.bf16 %v258_v38, %v257_v37  ;;  %v260_v41 = vld [vmem:[#allocation4 + $0x48] sm:$0xff]  ;;  %v261_v43 = vld [vmem:[#allocation4 + $0x50] sm:$0xff]  ;;  %v262_v44 = vld [vmem:[#allocation4 + $0x58] sm:$0xff] }
  0x40   :  { %619 = vmatprep.subr.bf16.mxu1 %v770_v1  ;;  %640 = vmatprep.subr.bf16.mxu0 %v770_v1  ;;  %v650_v42 = vpack.c.bf16 %v260_v41, %v259_v40  ;;  %v653_v45 = vpack.c.bf16 %v262_v44, %v261_v43  ;;  %v263_v46 = vld [vmem:[#allocation4 + $0x60] sm:$0xff]  ;;  %v264_v47 = vld [vmem:[#allocation4 + $0x68] sm:$0xff]  ;;  %v265_v54 = vld [vmem:[#allocation4 + $0x70] sm:$0xff] }
  0x41   :  { %v656_v48 = vpack.c.bf16 %v264_v47, %v263_v46  ;;  %v445_v49 = vld [vmem:[%s929_s2] ss:$0 sm:$0xff]  ;;  %v266_v55 = vld [vmem:[#allocation4 + $0x78] sm:$0xff]  ;;  %v346_v58 = vld [vmem:[#allocation6 + $0x8] sm:$0xff] }
  0x42   :  { %v659_v56 = vpack.c.bf16 %v266_v55, %v265_v54  ;;  %v345_v57 = vld [vmem:[#allocation6] sm:$0xff]  ;;  %v347_v59 = vld [vmem:[#allocation6 + $0x10] sm:$0xff]  ;;  %v348_v61 = vld [vmem:[#allocation6 + $0x18] sm:$0xff] }
  0x43   :  { %621 = vmatpush3.bf16.msra.mxu1 %v620_v12  ;;  %642 = vmatpush3.bf16.msra.mxu0 %v641_v33  ;;  %v662_v60 = vpack.c.bf16 %v346_v58, %v345_v57  ;;  %v665_v62 = vpack.c.bf16 %v348_v61, %v347_v59  ;;  %v349_v63 = vld [vmem:[#allocation6 + $0x20] sm:$0xff]  ;;  %v350_v2 = vld [vmem:[#allocation6 + $0x28] sm:$0xff]  ;;  %v352_v4 = vld [vmem:[#allocation6 + $0x38] sm:$0xff] }
  0x44   :  { %622 = vmatprep.subr.bf16.mxu1 %v770_v1  ;;  %643 = vmatprep.subr.bf16.mxu0 %v770_v1  ;;  %v668_v3 = vpack.c.bf16 %v350_v2, %v349_v63  ;;  %v353_v6 = vld [vmem:[#allocation6 + $0x40] sm:$0xff]  ;;  %v354_v7 = vld [vmem:[#allocation6 + $0x48] sm:$0xff]  ;;  %v355_v9 = vld [vmem:[#allocation6 + $0x50] sm:$0xff] }
  0x45   :  { %v674_v8 = vpack.c.bf16 %v354_v7, %v353_v6  ;;  %v356_v10 = vld [vmem:[#allocation6 + $0x58] sm:$0xff]  ;;  %v357_v12 = vld [vmem:[#allocation6 + $0x60] sm:$0xff]  ;;  %v358_v13 = vld [vmem:[#allocation6 + $0x68] sm:$0xff] }
  0x46   :  { %v677_v11 = vpack.c.bf16 %v356_v10, %v355_v9  ;;  %v680_v14 = vpack.c.bf16 %v358_v13, %v357_v12  ;;  %v359_v20 = vld [vmem:[#allocation6 + $0x70] sm:$0xff]  ;;  %v448_v23 = vld [vmem:[%s933_s6] ss:$0 sm:$0xff] }
  0x47   :  { %624 = vmatpush3.bf16.msra.mxu1 %v623_v15  ;;  %645 = vmatpush3.bf16.msra.mxu0 %v644_v36  ;;  %v447_v15 = vld [vmem:[%s931_s4] ss:$0 sm:$0xff] }
  0x48   :  { %625 = vmatprep.subr.bf16.mxu1 %v770_v1  ;;  %646 = vmatprep.subr.bf16.mxu0 %v770_v1 }
  0x4b   :  { %627 = vmatpush3.bf16.msra.mxu1 %v626_v18  ;;  %648 = vmatpush3.bf16.msra.mxu0 %v647_v39 }
  0x4c   :  { %628 = vmatprep.subr.bf16.mxu1 %v770_v1  ;;  %649 = vmatprep.subr.bf16.mxu0 %v770_v1 }
  0x4f   :  { %630 = vmatpush3.bf16.msra.mxu1 %v629_v21  ;;  %651 = vmatpush3.bf16.msra.mxu0 %v650_v42  ;;  %v360_v21 = vld [vmem:[#allocation6 + $0x78] sm:$0xff] }
  0x50   :  { %631 = vmatprep.subr.bf16.mxu1 %v770_v1  ;;  %652 = vmatprep.subr.bf16.mxu0 %v770_v1  ;;  %v683_v22 = vpack.c.bf16 %v360_v21, %v359_v20 }
  0x53   :  { %633 = vmatpush3.bf16.msra.mxu1 %v632_v24  ;;  %654 = vmatpush3.bf16.msra.mxu0 %v653_v45 }
  0x54   :  { %634 = vmatprep.subr.bf16.mxu1 %v770_v1  ;;  %655 = vmatprep.subr.bf16.mxu0 %v770_v1 }
  0x57   :  { %636 = vmatpush3.bf16.msra.mxu1 %v635_v27  ;;  %657 = vmatpush3.bf16.msra.mxu0 %v656_v48  ;;  %v449_v27 = vld [vmem:[%s935_s8] ss:$0 sm:$0xff] }
  0x58   :  { %661 = vmatprep.subr.bf16.mxu1 %v770_v1  ;;  %658 = vmatprep.subr.bf16.mxu0 %v770_v1 }
  0x5b   :  { %660 = vmatpush3.bf16.msra.mxu0 %v659_v56 }
 0x10c   :  { %v152_v50 = vpop.f32.mrb[0].mxu0 }
 0x10d   :  { %v153_v51 = vadd.f32 %v445_v49, %v152_v50  ;;  %v507_v52 = vpop.f32.mrb[1].mxu0 }
 0x10f   :  { %v156_v53 = vmax.f32 %v153_v51, 0.0 }
 0x111   :  { %541 = vmatmul.mubr.f32.vlgmr.msra.gmra.mrb[0].mxu1 %v156_v53 }
 0x112   :  { %610 = vmatprep.mubr.msk.f32.mxu1 %vm769_vm0, %v768_v0  ;;  %663 = vmatpush3.bf16.msra.mxu1 %v662_v60  ;;  %v351_v0 = vld [vmem:[#allocation6 + $0x30] sm:$0xff] }
 0x113   :  { %664 = vmatprep.subr.bf16.mxu1 %v770_v1  ;;  %v671_v5 = vpack.c.bf16 %v352_v4, %v351_v0 }
 0x116   :  { %666 = vmatpush3.bf16.msra.mxu1 %v665_v62 }
 0x117   :  { %667 = vmatprep.subr.bf16.mxu1 %v770_v1 }
 0x11a   :  { %669 = vmatpush3.bf16.msra.mxu1 %v668_v3 }
 0x11b   :  { %670 = vmatprep.subr.bf16.mxu1 %v770_v1 }
 0x11e   :  { %672 = vmatpush3.bf16.msra.mxu1 %v671_v5 }
 0x11f   :  { %673 = vmatprep.subr.bf16.mxu1 %v770_v1 }
 0x122   :  { %675 = vmatpush3.bf16.msra.mxu1 %v674_v8 }
 0x123   :  { %676 = vmatprep.subr.bf16.mxu1 %v770_v1 }
 0x126   :  { %678 = vmatpush3.bf16.msra.mxu1 %v677_v11 }
 0x127   :  { %679 = vmatprep.subr.bf16.mxu1 %v770_v1 }
 0x12a   :  { %681 = vmatpush3.bf16.msra.mxu1 %v680_v14 }
 0x12b   :  { %682 = vmatprep.subr.bf16.mxu1 %v770_v1 }
 0x12e   :  { %684 = vmatpush3.bf16.msra.mxu1 %v683_v22 }
 0x1e4   :  { %v246_v16 = vpop.f32.mrb[0].mxu1 }
 0x1e5   :  { %v247_v17 = vadd.f32 %v447_v15, %v246_v16  ;;  %v542_v18 = vpop.f32.mrb[1].mxu1 }
 0x1e7   :  { %v250_v19 = vmax.f32 %v247_v17, 0.0 }
 0x1e9   :  { %576 = vmatmul.mubr.f32.vlgmr.msra.gmra.mrb[2].mxu0 %v250_v19 }
 0x2bc   :  { %v340_v24 = vpop.f32.mrb[2].mxu0 }
 0x2bd   :  { %v341_v25 = vadd.f32 %v448_v23, %v340_v24  ;;  %v577_v1 = vpop.f32.mrb[3].mxu0 }
 0x2bf   :  { %v344_v26 = vmax.f32 %v341_v25, 0.0 }
 0x2c1   :  { %611 = vmatmul.mubr.f32.vlgmr.msra.gmra.mrb[2].mxu1 %v344_v26 }
 0x394   :  { %v434_v28 = vpop.f32.mrb[2].mxu1 }
 0x395   :  { %v435_v29 = vadd.f32 %v449_v27, %v434_v28  ;;  %v612_v30 = vpop.f32.mrb[3].mxu1 }
 0x397   :  { %438 = vst [vmem:[%s936_s9] sm:$0xff] %v435_v29 }
 0x398   :  { %443 = vsyncpa [#allocation3], 1 }
 0x399   :  { %444 = vsyncpa [#allocation5], 1 }

</bundles_post_ra>
